<compile_context>
chip_gen: v7x
topology: tpu7x:2x2x1
jax: 0.10.0
libtpu: 0.0.40
codegen_flags: <defaults>
</compile_context>

<pallas_src>
import jax
import jax.numpy as jnp
from jax.experimental import pallas as pl
from jax.experimental.pallas import tpu as pltpu

HIDDEN = 256
MAX_TILE = 2048  # <= default scoped-VMEM limit on all generations (incl. v5e)


def actor_kernel(x_ref, w1_ref, b1_ref, w2_ref, b2_ref, w3_ref, b3_ref, o_ref):
    # Cast observations to the MXU feed dtype in-kernel (free VPU work hidden
    # under the matmuls; avoids a separate XLA cast pass over x in HBM).
    x = x_ref[...].astype(w1_ref.dtype)

    # Layer 1: Linear + ReLU (f32 accumulate; bias/ReLU in f32).
    h1 = jnp.dot(x, w1_ref[...], preferred_element_type=jnp.float32) + b1_ref[...]
    h1 = jnp.maximum(h1, 0.0)

    # Layer 2: Linear + ReLU (feed MXU in the weights' dtype, accumulate f32).
    h2 = jnp.dot(h1.astype(w2_ref.dtype), w2_ref[...],
                 preferred_element_type=jnp.float32) + b2_ref[...]
    h2 = jnp.maximum(h2, 0.0)

    # Layer 3: Linear + Tanh; true (unpadded) act_dim output.
    out = jnp.dot(h2.astype(w3_ref.dtype), w3_ref[...],
                  preferred_element_type=jnp.float32) + b3_ref[...]
    o_ref[...] = jnp.tanh(out).astype(o_ref.dtype)


def _round_up(n, m):
    return ((n + m - 1) // m) * m


def _choose_tile(batch):
    """Batch tile size.

    - batch <= 256: a single block spanning the whole batch (block dim equals
      the full array dim, so any batch size is legal).
    - batch  > 256: large MXU-shaped tiles (multiple of 256, capped at 2048),
      sized so the grid has at least two steps -> both v7x TensorCores get
      work; tile never exceeds the batch, so only the standard ragged last
      block occurs.
    """
    if batch <= 256:
        return batch
    half = _round_up(pl.cdiv(batch, 2), 256)
    return min(MAX_TILE, half)


def actor_forward(x, params, *, compute_dtype=jnp.bfloat16):
    """Fused actor MLP forward.

    x: (B, obs_dim) float32.
    params: dict with w{1,2,3} stored as (in, out) and b{1,2,3} as (1, out).
    compute_dtype: MXU input dtype (default bf16; None -> pure f32 path).
        Accumulation and the elementwise epilogue are always f32.
    """
    w1, b1, w2, b2, w3, b3 = (
        params["w1"], params["b1"],
        params["w2"], params["b2"],
        params["w3"], params["b3"],
    )
    B, obs_dim = x.shape
    hidden = w1.shape[1]
    act_dim = w3.shape[1]
    out_dtype = x.dtype

    if compute_dtype is not None:
        # Tiny one-off weight casts; x is cast inside the kernel, biases stay
        # f32 (bias-add / ReLU / tanh run in the f32 accumulator).
        w1 = w1.astype(compute_dtype)
        w2 = w2.astype(compute_dtype)
        w3 = w3.astype(compute_dtype)

    tb = _choose_tile(B)
    grid = (pl.cdiv(B, tb),)  # ragged last block handled by Pallas; rows independent

    def resident(a):
        # Constant block index: DMA'd once, stays VMEM-resident across the grid.
        return pl.BlockSpec(a.shape, lambda i: (0, 0))

    itemsize = jnp.dtype(out_dtype).itemsize
    flops = 2 * B * (obs_dim * hidden + hidden * hidden + hidden * act_dim)
    bytes_accessed = (
        B * obs_dim * itemsize
        + sum(int(a.size) * a.dtype.itemsize for a in (w1, b1, w2, b2, w3, b3))
        + B * act_dim * itemsize
    )
    cost = pl.CostEstimate(flops=int(flops),
                           transcendentals=int(B * act_dim),
                           bytes_accessed=int(bytes_accessed))

    out = pl.pallas_call(
        actor_kernel,
        out_shape=jax.ShapeDtypeStruct((B, act_dim), out_dtype),
        grid=grid,
        in_specs=[
            pl.BlockSpec((tb, obs_dim), lambda i: (i, 0)),
            resident(w1), resident(b1),
            resident(w2), resident(b2),
            resident(w3), resident(b3),
        ],
        out_specs=pl.BlockSpec((tb, act_dim), lambda i: (i, 0)),
        compiler_params=pltpu.CompilerParams(
            # Batch tiles are independent -> shard across TCs on v7x megacore.
            dimension_semantics=("parallel",),
        ),
        cost_estimate=cost,
    )(x, w1, b1, w2, b2, w3, b3)

    return out


def init_params(key, obs_dim, act_dim, hidden=HIDDEN):
    """Deterministic synthetic init matching PyTorch Linear shapes.

    PyTorch nn.Linear(in, out) has weight (out, in); we store its transpose
    (in, out) so the kernel does x @ W directly.
    """
    ks = jax.random.split(key, 6)

    def uniform_init(k, fan_in, shape):
        bound = 1.0 / jnp.sqrt(fan_in)
        return jax.random.uniform(k, shape, jnp.float32, -bound, bound)

    return {
        "w1": uniform_init(ks[0], obs_dim, (obs_dim, hidden)),
        "b1": uniform_init(ks[1], obs_dim, (1, hidden)),
        "w2": uniform_init(ks[2], hidden, (hidden, hidden)),
        "b2": uniform_init(ks[3], hidden, (1, hidden)),
        "w3": uniform_init(ks[4], hidden, (hidden, act_dim)),
        "b3": uniform_init(ks[5], hidden, (1, act_dim)),
    }


def actor_reference(x, params):
    """Pure-JAX reference of the PyTorch forward."""
    h1 = jax.nn.relu(x @ params["w1"] + params["b1"])
    h2 = jax.nn.relu(h1 @ params["w2"] + params["b2"])
    return jnp.tanh(h2 @ params["w3"] + params["b3"])


if __name__ == "__main__":
    key = jax.random.PRNGKey(0)
    k_x, k_x2, k_p = jax.random.split(key, 3)

    obs_dim, act_dim = 8, 4
    params = init_params(k_p, obs_dim, act_dim)

    # Small batch: single full-dim tile.
    batch = 2
    x = jax.random.normal(k_x, (batch, obs_dim), jnp.float32)
    ref = actor_reference(x, params)

    # Default bf16 MXU-feed path (f32 accumulation): looser tolerance expected
    # from casting x/weights to bf16 before the MXU.
    out_bf16 = jax.block_until_ready(actor_forward(x, params))
    assert out_bf16.shape == (batch, act_dim)
    assert jnp.allclose(out_bf16, ref, atol=5e-2, rtol=5e-2)

    # Pure f32 path: tight check against the reference.
    out_f32 = jax.block_until_ready(actor_forward(x, params, compute_dtype=None))
    assert out_f32.shape == (batch, act_dim)
    assert jnp.allclose(out_f32, ref, atol=2e-3, rtol=2e-3)

    # Medium batch exercising the multi-tile grid and the ragged last block
    # (no wrapper padding of x; Pallas handles the partial block).
    batch2 = 300
    x2 = jax.random.normal(k_x2, (batch2, obs_dim), jnp.float32)
    ref2 = actor_reference(x2, params)
    out2 = jax.block_until_ready(actor_forward(x2, params, compute_dtype=None))
    assert out2.shape == (batch2, act_dim)
    assert jnp.allclose(out2, ref2, atol=2e-3, rtol=2e-3)

    print("KERNEL_OK")
</pallas_src>

<mosaic_0001>
module attributes {stable_mosaic.version = 11 : i64} {
  func.func @actor_kernel(%arg0: i32, %arg1: memref<2x8xf32, #tpu.memory_space<vmem>>, %arg2: memref<8x256xbf16, #tpu.memory_space<vmem>>, %arg3: memref<1x256xf32, #tpu.memory_space<vmem>>, %arg4: memref<256x256xbf16, #tpu.memory_space<vmem>>, %arg5: memref<1x256xf32, #tpu.memory_space<vmem>>, %arg6: memref<256x4xbf16, #tpu.memory_space<vmem>>, %arg7: memref<1x4xf32, #tpu.memory_space<vmem>>, %arg8: memref<2x4xf32, #tpu.memory_space<vmem>>) attributes {dimension_semantics = [#tpu.dimension_semantics<parallel>], iteration_bounds = array<i64: 1>, scalar_prefetch = 0 : i64, scratch_operands = 0 : i64, tpu.core_type = #tpu.core_type<tc>, window_params = [{transform_indices = @transform_0, window_bounds = array<i64: 2, 8>}, {pipeline_mode = #tpu.pipeline_mode<synchronous>, transform_indices = @transform_1, window_bounds = array<i64: 8, 256>}, {pipeline_mode = #tpu.pipeline_mode<synchronous>, transform_indices = @transform_2, window_bounds = array<i64: 1, 256>}, {pipeline_mode = #tpu.pipeline_mode<synchronous>, transform_indices = @transform_3, window_bounds = array<i64: 256, 256>}, {pipeline_mode = #tpu.pipeline_mode<synchronous>, transform_indices = @transform_4, window_bounds = array<i64: 1, 256>}, {pipeline_mode = #tpu.pipeline_mode<synchronous>, transform_indices = @transform_5, window_bounds = array<i64: 256, 4>}, {pipeline_mode = #tpu.pipeline_mode<synchronous>, transform_indices = @transform_6, window_bounds = array<i64: 1, 4>}, {transform_indices = @transform_7, window_bounds = array<i64: 2, 4>}]} {
    %c0 = arith.constant 0 : index
    %c0_0 = arith.constant 0 : index
    %0 = vector.load %arg1[%c0, %c0_0] : memref<2x8xf32, #tpu.memory_space<vmem>>, vector<2x8xf32>
    %1 = arith.truncf %0 : vector<2x8xf32> to vector<2x8xbf16>
    %c0_1 = arith.constant 0 : index
    %c0_2 = arith.constant 0 : index
    %2 = vector.load %arg2[%c0_1, %c0_2] : memref<8x256xbf16, #tpu.memory_space<vmem>>, vector<8x256xbf16>
    %cst = arith.constant dense<0.000000e+00> : vector<2x256xf32>
    %3 = tpu.matmul %1, %2, %cst {dimension_numbers = #tpu.dot_dimension_numbers<[1], [0], [0], [1], [0, 0, 1, 1], [], []>} : vector<2x8xbf16>, vector<8x256xbf16>, vector<2x256xf32> -> vector<2x256xf32>
    %c0_3 = arith.constant 0 : index
    %c0_4 = arith.constant 0 : index
    %4 = vector.load %arg3[%c0_3, %c0_4] : memref<1x256xf32, #tpu.memory_space<vmem>>, vector<1x256xf32>
    %5 = vector.broadcast %4 : vector<1x256xf32> to vector<2x256xf32>
    %6 = arith.addf %3, %5 : vector<2x256xf32>
    %cst_5 = arith.constant 0.000000e+00 : f32
    %7 = vector.broadcast %cst_5 : f32 to vector<2x256xf32>
    %8 = arith.maximumf %6, %7 : vector<2x256xf32>
    %9 = arith.truncf %8 : vector<2x256xf32> to vector<2x256xbf16>
    %c0_6 = arith.constant 0 : index
    %c0_7 = arith.constant 0 : index
    %10 = vector.load %arg4[%c0_6, %c0_7] : memref<256x256xbf16, #tpu.memory_space<vmem>>, vector<256x256xbf16>
    %cst_8 = arith.constant dense<0.000000e+00> : vector<2x256xf32>
    %11 = tpu.matmul %9, %10, %cst_8 {dimension_numbers = #tpu.dot_dimension_numbers<[1], [0], [0], [1], [0, 0, 1, 1], [], []>} : vector<2x256xbf16>, vector<256x256xbf16>, vector<2x256xf32> -> vector<2x256xf32>
    %c0_9 = arith.constant 0 : index
    %c0_10 = arith.constant 0 : index
    %12 = vector.load %arg5[%c0_9, %c0_10] : memref<1x256xf32, #tpu.memory_space<vmem>>, vector<1x256xf32>
    %13 = vector.broadcast %12 : vector<1x256xf32> to vector<2x256xf32>
    %14 = arith.addf %11, %13 : vector<2x256xf32>
    %cst_11 = arith.constant 0.000000e+00 : f32
    %15 = vector.broadcast %cst_11 : f32 to vector<2x256xf32>
    %16 = arith.maximumf %14, %15 : vector<2x256xf32>
    %17 = arith.truncf %16 : vector<2x256xf32> to vector<2x256xbf16>
    %c0_12 = arith.constant 0 : index
    %c0_13 = arith.constant 0 : index
    %18 = vector.load %arg6[%c0_12, %c0_13] : memref<256x4xbf16, #tpu.memory_space<vmem>>, vector<256x4xbf16>
    %cst_14 = arith.constant dense<0.000000e+00> : vector<2x4xf32>
    %19 = tpu.matmul %17, %18, %cst_14 {dimension_numbers = #tpu.dot_dimension_numbers<[1], [0], [0], [1], [0, 0, 1, 1], [], []>} : vector<2x256xbf16>, vector<256x4xbf16>, vector<2x4xf32> -> vector<2x4xf32>
    %c0_15 = arith.constant 0 : index
    %c0_16 = arith.constant 0 : index
    %20 = vector.load %arg7[%c0_15, %c0_16] : memref<1x4xf32, #tpu.memory_space<vmem>>, vector<1x4xf32>
    %21 = vector.broadcast %20 : vector<1x4xf32> to vector<2x4xf32>
    %22 = arith.addf %19, %21 : vector<2x4xf32>
    %23 = math.tanh %22 : vector<2x4xf32>
    %c0_17 = arith.constant 0 : index
    %c0_18 = arith.constant 0 : index
    %24 = vector.load %arg8[%c0_17, %c0_18] : memref<2x4xf32, #tpu.memory_space<vmem>>, vector<2x4xf32>
    tpu.vector_store %arg8[%c0_17, %c0_18], %23 {strides = array<i32>} : memref<2x4xf32, #tpu.memory_space<vmem>>, vector<2x4xf32>,
    return
  }
  func.func @transform_0(%arg0: i32) -> (i32, i32) {
    %c0_i32 = arith.constant 0 : i32
    %c0_i32_0 = arith.constant 0 : i32
    return %arg0, %c0_i32 : i32, i32
  }
  func.func @transform_1(%arg0: i32) -> (i32, i32) {
    %c0_i32 = arith.constant 0 : i32
    %c0_i32_0 = arith.constant 0 : i32
    %c0_i32_1 = arith.constant 0 : i32
    return %c0_i32, %c0_i32_0 : i32, i32
  }
  func.func @transform_2(%arg0: i32) -> (i32, i32) {
    %c0_i32 = arith.constant 0 : i32
    %c0_i32_0 = arith.constant 0 : i32
    %c0_i32_1 = arith.constant 0 : i32
    return %c0_i32, %c0_i32_0 : i32, i32
  }
  func.func @transform_3(%arg0: i32) -> (i32, i32) {
    %c0_i32 = arith.constant 0 : i32
    %c0_i32_0 = arith.constant 0 : i32
    %c0_i32_1 = arith.constant 0 : i32
    return %c0_i32, %c0_i32_0 : i32, i32
  }
  func.func @transform_4(%arg0: i32) -> (i32, i32) {
    %c0_i32 = arith.constant 0 : i32
    %c0_i32_0 = arith.constant 0 : i32
    %c0_i32_1 = arith.constant 0 : i32
    return %c0_i32, %c0_i32_0 : i32, i32
  }
  func.func @transform_5(%arg0: i32) -> (i32, i32) {
    %c0_i32 = arith.constant 0 : i32
    %c0_i32_0 = arith.constant 0 : i32
    %c0_i32_1 = arith.constant 0 : i32
    return %c0_i32, %c0_i32_0 : i32, i32
  }
  func.func @transform_6(%arg0: i32) -> (i32, i32) {
    %c0_i32 = arith.constant 0 : i32
    %c0_i32_0 = arith.constant 0 : i32
    %c0_i32_1 = arith.constant 0 : i32
    return %c0_i32, %c0_i32_0 : i32, i32
  }
  func.func @transform_7(%arg0: i32) -> (i32, i32) {
    %c0_i32 = arith.constant 0 : i32
    %c0_i32_0 = arith.constant 0 : i32
    return %arg0, %c0_i32 : i32, i32
  }
}

</mosaic_0001>

<bundles_post_ra>
// kernel: tpu_custom_call.1
= control target key start
LH: loop header
LB: loop body
LE: loop exit
PB: predicated region body
PF: predicated region fallthrough
CT: control target
= control target key end

     0   :  { %12 = vsyncpa [#allocation3], 0  ;;  %s888_s0 = inlined_call_operand.vmem [shape: f32[2,8], index: 0, kind: input, shape index: {}]   ;;  %s889_s1 = inlined_call_operand.vmem [shape: bf16[8,256], index: 1, kind: input, shape index: {}]   ;;  %s890_s2 = inlined_call_operand.vmem [shape: f32[1,256], index: 2, kind: input, shape index: {}]   ;;  %s891_s3 = inlined_call_operand.hbm [shape: bf16[256,256], index: 3, kind: input, shape index: {}]   ;;  %s892_s4 = inlined_call_operand.vmem [shape: f32[1,256], index: 4, kind: input, shape index: {}]   ;;  %s893_s5 = inlined_call_operand.vmem [shape: bf16[256,4], index: 5, kind: input, shape index: {}]   ;;  %s894_s6 = inlined_call_operand.vmem [shape: f32[1,4], index: 6, kind: input, shape index: {}]   ;;  %s895_s7 = inlined_call_operand.hbm [shape: f32[2,4], index: 7, kind: output, shape index: {}]  }
   0x1   :  { %13 = vsyncpa [#allocation4], 0  ;;  %s756_s24 = smov [#allocation2]   ;;  %s708_s28 = scalar_lea.hbm %s891_s3, 4096 }
   0x2   :  { %s25_s25 = sshll.u32 %s756_s24, 4  ;;  %p709_p0 = scmp.ne.s32.totalorder %s891_s3, %s708_s28  ;;  %s26_s25 = int_to_ptr.vmem [resolvable:$true] %s25_s25 }
   0x3   :  { %p712_p1 = scmp.lt.u32.totalorder %s708_s28, %s891_s3 }
   0x5   :  { %p714_p2 = pnand %p712_p1, %p709_p0 }
   0x7   :  { %717 = shalt.err (!%p714_p2)
}
   0x8   :  { %s718_s10 = scalar_lea.vmem %s26_s25, 4096  ;;  %p723_p4 = scmp.lt.s32.totalorder %s26_s25, %s26_s25 }
   0x9   :  { %p719_p3 = scmp.ne.s32.totalorder %s26_s25, %s718_s10  ;;  %p724_p5 = scmp.lt.s32.totalorder %s718_s10, %s718_s10 }
   0xb   :  { %p725_p6 = por %p724_p5, %p723_p4 }
   0xd   :  { %p726_p7 = pnand %p725_p6, %p719_p3 }
   0xf   :  { %729 = shalt.err (!%p726_p7)
}
  0x10   :  { %s757_s11 = smov 128   ;;  %s758_s12 = smov 8  }
  0x11   :  { %31 = dma.hbm_to_vmem [thread:$0]  %s891_s3, 4096, %s26_s25, [#allocation3], %s757_s11, %s757_s11, %s758_s12  }
  0x12   :  { %752 = dma.done.wait [#allocation3], 4096  }
  0x13   :  { %753 = vsyncadd [#allocation3], 4294963200  ;;  %v759_v0 = vmov 0   ;;  %v44_v1 = vld [vmem:[%s889_s1] sm:$0xff]  ;;  %vm66_vm0 = vcmask 1043456   ;;  %vm62_vm1 = vcmask 64512   ;;  %v47_v51 = vlaneseq }
  0x14   :  { %105 = vmatprep.mubr.bf16.mxu0 %v759_v0  ;;  %v42_v2 = vld [vmem:[%s888_s0] sm:$0x3]  ;;  %v561_v3 = vcombine.high %v44_v1, %v44_v1  ;;  %v560_v4 = vcombine.low %v44_v1, %v44_v1  ;;  %v642_v5 = vld [vmem:[#allocation2 + $0x4] ss:$8 sps:$4 sm:$0xff]   ;;  %v645_v7 = vld [vmem:[#allocation2 + $0x14] ss:$8 sps:$4 sm:$0xff]  }
  0x15   :  { %v644_v6 = vld [vmem:[#allocation2] ss:$8 sps:$4 sm:$0xff]   ;;  %v43_v9 = vpack.c.bf16 %v42_v2, %v42_v2  ;;  %322 = vmatprep.subr.bf16.mxu1 %v642_v5  ;;  %v647_v10 = vld [vmem:[#allocation2 + $0x10] ss:$8 sps:$4 sm:$0xff]   ;;  %v648_v11 = vld [vmem:[#allocation2 + $0x24] ss:$8 sps:$4 sm:$0xff]  }
  0x16   :  { %562 = vmatprep.subr.msk.bf16.mxu0 %vm66_vm0, %v561_v3  ;;  %v68_v8 = vsel %vm66_vm0, %v560_v4, 0  ;;  %323 = vmatpush1.bf16.msra.mxu1 %v644_v6  ;;  %v650_v12 = vld [vmem:[#allocation2 + $0x20] ss:$8 sps:$4 sm:$0xff]   ;;  %v651_v13 = vld [vmem:[#allocation2 + $0x34] ss:$8 sps:$4 sm:$0xff]   ;;  %v48_v52 = vshrl.u32 %v47_v51, 7 }
  0x17   :  { %74 = vmatpush1.bf16.msra.mxu0 %v68_v8  ;;  %324 = vmatprep.subr.bf16.mxu1 %v645_v7  ;;  %v653_v14 = vld [vmem:[#allocation2 + $0x30] ss:$8 sps:$4 sm:$0xff]   ;;  %v654_v15 = vld [vmem:[#allocation2 + $0x44] ss:$8 sps:$4 sm:$0xff]   ;;  %v656_v16 = vld [vmem:[#allocation2 + $0x40] ss:$8 sps:$4 sm:$0xff]  }
  0x18   :  { %v657_v17 = vld [vmem:[#allocation2 + $0x54] ss:$8 sps:$4 sm:$0xff]   ;;  %v659_v18 = vld [vmem:[#allocation2 + $0x50] ss:$8 sps:$4 sm:$0xff]   ;;  %v660_v19 = vld [vmem:[#allocation2 + $0x64] ss:$8 sps:$4 sm:$0xff]  }
  0x19   :  { %v662_v20 = vld [vmem:[#allocation2 + $0x60] ss:$8 sps:$4 sm:$0xff]   ;;  %v663_v21 = vld [vmem:[#allocation2 + $0x74] ss:$8 sps:$4 sm:$0xff]   ;;  %v665_v22 = vld [vmem:[#allocation2 + $0x70] ss:$8 sps:$4 sm:$0xff]  }
  0x1a   :  { %563 = vmatmul.mubr.msk.bf16.vlgmr.msra.gmra.mrb[0].mxu0 %vm62_vm1, %v43_v9  ;;  %325 = vmatpush1.bf16.msra.mxu1 %v647_v10  ;;  %v666_v23 = vld [vmem:[#allocation2 + $0x84] ss:$8 sps:$4 sm:$0xff]   ;;  %v668_v24 = vld [vmem:[#allocation2 + $0x80] ss:$8 sps:$4 sm:$0xff]   ;;  %v669_v25 = vld [vmem:[#allocation2 + $0x94] ss:$8 sps:$4 sm:$0xff]  }
  0x1b   :  { %326 = vmatprep.subr.bf16.mxu1 %v648_v11  ;;  %v671_v26 = vld [vmem:[#allocation2 + $0x90] ss:$8 sps:$4 sm:$0xff]   ;;  %v672_v27 = vld [vmem:[#allocation2 + $0xa4] ss:$8 sps:$4 sm:$0xff]   ;;  %v674_v28 = vld [vmem:[#allocation2 + $0xa0] ss:$8 sps:$4 sm:$0xff]  }
  0x1c   :  { %v675_v29 = vld [vmem:[#allocation2 + $0xb4] ss:$8 sps:$4 sm:$0xff]   ;;  %v677_v30 = vld [vmem:[#allocation2 + $0xb0] ss:$8 sps:$4 sm:$0xff]   ;;  %v678_v31 = vld [vmem:[#allocation2 + $0xc4] ss:$8 sps:$4 sm:$0xff]  }
  0x1d   :  { %v680_v32 = vld [vmem:[#allocation2 + $0xc0] ss:$8 sps:$4 sm:$0xff]   ;;  %v681_v33 = vld [vmem:[#allocation2 + $0xd4] ss:$8 sps:$4 sm:$0xff]   ;;  %v683_v34 = vld [vmem:[#allocation2 + $0xd0] ss:$8 sps:$4 sm:$0xff]  }
  0x1e   :  { %327 = vmatpush1.bf16.msra.mxu1 %v650_v12  ;;  %v684_v35 = vld [vmem:[#allocation2 + $0xe4] ss:$8 sps:$4 sm:$0xff]   ;;  %v686_v36 = vld [vmem:[#allocation2 + $0xe0] ss:$8 sps:$4 sm:$0xff]   ;;  %v687_v37 = vld [vmem:[#allocation2 + $0xf4] ss:$8 sps:$4 sm:$0xff]  }
  0x1f   :  { %328 = vmatprep.subr.bf16.mxu1 %v651_v13  ;;  %v689_v38 = vld [vmem:[#allocation2 + $0xf0] ss:$8 sps:$4 sm:$0xff]   ;;  %v690_v39 = vld [vmem:[%s893_s5 + $0x40] sm:$0xff]   ;;  %v692_v41 = vld [vmem:[%s893_s5 + $0x48] sm:$0xff]   ;;  %v49_v53 = vsub.s32 0, %v48_v52  ;;  %v53_v55 = vsub.s32 1, %v48_v52 }
  0x20   :  { %v691_v40 = vld [vmem:[%s893_s5] sm:$0xff]   ;;  %613 = vmatprep.subr.bf16.mxu0 %v690_v39  ;;  %v693_v42 = vld [vmem:[%s893_s5 + $0x8] sm:$0xff]   ;;  %v694_v43 = vld [vmem:[%s893_s5 + $0x50] sm:$0xff]   ;;  %vm543_vm2 = vcmask 25600  }
  0x21   :  { %614 = vmatpush3.bf16.msra.mxu0 %v691_v40  ;;  %v695_v44 = vld [vmem:[%s893_s5 + $0x10] sm:$0xff]   ;;  %v696_v45 = vld [vmem:[%s893_s5 + $0x58] sm:$0xff]   ;;  %v698_v47 = vld [vmem:[%s893_s5 + $0x60] sm:$0xff]  }
  0x22   :  { %329 = vmatpush1.bf16.msra.mxu1 %v653_v14  ;;  %615 = vmatprep.subr.bf16.mxu0 %v692_v41  ;;  %v697_v46 = vld [vmem:[%s893_s5 + $0x18] sm:$0xff]   ;;  %v699_v48 = vld [vmem:[%s893_s5 + $0x20] sm:$0xff]   ;;  %v700_v49 = vld [vmem:[%s893_s5 + $0x68] sm:$0xff]  }
  0x23   :  { %330 = vmatprep.subr.bf16.mxu1 %v654_v15  ;;  %v701_v50 = vld [vmem:[%s893_s5 + $0x28] sm:$0xff]   ;;  %v45_v54 = vld [vmem:[%s890_s2] sm:$0x3]  ;;  %v702_v4 = vld [vmem:[%s893_s5 + $0x70] sm:$0xff]  }
  0x24   :  { %v50_v56 = vrot.slane %v45_v54, %v49_v53  ;;  %v54_v57 = vrot.slane %v45_v54, %v53_v55  ;;  %v703_v5 = vld [vmem:[%s893_s5 + $0x30] sm:$0xff]   ;;  %v704_v6 = vld [vmem:[%s893_s5 + $0x78] sm:$0xff]   ;;  %v150_v8 = vld [vmem:[%s892_s4] sm:$0x3]  ;;  %s760_s4 = smov [#allocation5]  }
  0x25   :  { %616 = vmatpush3.bf16.msra.mxu0 %v693_v42  ;;  %v705_v7 = vld [vmem:[%s893_s5 + $0x38] sm:$0xff]   ;;  %v155_v9 = vrot.slane %v150_v8, %v49_v53  ;;  %v159_v10 = vrot.slane %v150_v8, %v53_v55  ;;  %s551_s26 = sshll.u32 %s760_s4, 4  ;;  %s552_s26 = int_to_ptr.vmem [resolvable:$true] %s551_s26 }
  0x26   :  { %331 = vmatpush1.bf16.msra.mxu1 %v656_v16  ;;  %617 = vmatprep.subr.bf16.mxu0 %v694_v43  ;;  %s730_s27 = scalar_lea.vmem %s552_s26, 32  ;;  %p735_p9 = scmp.lt.s32.totalorder %s552_s26, %s552_s26 }
  0x27   :  { %332 = vmatprep.subr.bf16.mxu1 %v657_v17  ;;  %p731_p8 = scmp.ne.s32.totalorder %s552_s26, %s730_s27  ;;  %p736_p10 = scmp.lt.s32.totalorder %s730_s27, %s730_s27 }
  0x29   :  { %618 = vmatpush3.bf16.msra.mxu0 %v695_v44  ;;  %p737_p11 = por %p736_p10, %p735_p9 }
  0x2a   :  { %333 = vmatpush1.bf16.msra.mxu1 %v659_v18  ;;  %619 = vmatprep.subr.bf16.mxu0 %v696_v45 }
  0x2b   :  { %334 = vmatprep.subr.bf16.mxu1 %v660_v19  ;;  %p738_p12 = pnand %p737_p11, %p731_p8 }
  0x2d   :  { %620 = vmatpush3.bf16.msra.mxu0 %v697_v46 }
  0x2e   :  { %335 = vmatpush1.bf16.msra.mxu1 %v662_v20  ;;  %621 = vmatprep.subr.bf16.mxu0 %v698_v47 }
  0x2f   :  { %336 = vmatprep.subr.bf16.mxu1 %v663_v21 }
  0x31   :  { %622 = vmatpush3.bf16.msra.mxu0 %v699_v48 }
  0x32   :  { %337 = vmatpush1.bf16.msra.mxu1 %v665_v22  ;;  %623 = vmatprep.subr.bf16.mxu0 %v700_v49  ;;  %v596_v22 = vld [vmem:[%s894_s6] ss:$0 sm:$0xff] }
  0x33   :  { %338 = vmatprep.subr.bf16.mxu1 %v666_v23 }
  0x35   :  { %624 = vmatpush3.bf16.msra.mxu0 %v701_v50 }
  0x36   :  { %339 = vmatpush1.bf16.msra.mxu1 %v668_v24  ;;  %625 = vmatprep.subr.bf16.mxu0 %v702_v4 }
  0x37   :  { %340 = vmatprep.subr.bf16.mxu1 %v669_v25 }
  0x39   :  { %626 = vmatpush3.bf16.msra.mxu0 %v703_v5 }
  0x3a   :  { %341 = vmatpush1.bf16.msra.mxu1 %v671_v26  ;;  %627 = vmatprep.subr.bf16.mxu0 %v704_v6 }
  0x3b   :  { %342 = vmatprep.subr.bf16.mxu1 %v672_v27 }
  0x3d   :  { %628 = vmatpush3.bf16.msra.mxu0 %v705_v7 }
  0x3e   :  { %343 = vmatpush1.bf16.msra.mxu1 %v674_v28 }
  0x3f   :  { %344 = vmatprep.subr.bf16.mxu1 %v675_v29 }
  0x42   :  { %345 = vmatpush1.bf16.msra.mxu1 %v677_v30 }
  0x43   :  { %346 = vmatprep.subr.bf16.mxu1 %v678_v31 }
  0x46   :  { %347 = vmatpush1.bf16.msra.mxu1 %v680_v32 }
  0x47   :  { %348 = vmatprep.subr.bf16.mxu1 %v681_v33 }
  0x4a   :  { %349 = vmatpush1.bf16.msra.mxu1 %v683_v34 }
  0x4b   :  { %350 = vmatprep.subr.bf16.mxu1 %v684_v35 }
  0x4e   :  { %351 = vmatpush1.bf16.msra.mxu1 %v686_v36 }
  0x4f   :  { %352 = vmatprep.subr.bf16.mxu1 %v687_v37 }
  0x52   :  { %353 = vmatpush1.bf16.msra.mxu1 %v689_v38 }
  0xed   :  { %v107_v58 = vpop.f32.mrb[0].mxu0 }
  0xee   :  { %v108_v59 = vadd.f32 %v107_v58, %v50_v56  ;;  %v109_v60 = vpop.f32.mrb[1].mxu0 }
  0xef   :  { %v110_v61 = vadd.f32 %v109_v60, %v54_v57  ;;  %v111_v62 = vpop.f32.mrb[2].mxu0 }
  0xf0   :  { %v114_v63 = vmax.f32 %v108_v59, 0.0  ;;  %v112_v0 = vpop.f32.mrb[3].mxu0 }
  0xf1   :  { %v115_v1 = vmax.f32 %v110_v61, 0.0 }
  0xf2   :  { %v116_v3 = vpack.c.bf16 %v114_v63, %v114_v63 }
  0xf3   :  { %v117_v2 = vpack.c.bf16 %v115_v1, %v115_v1 }
  0xf5   :  { %354 = vmatprep.mubr.bf16.mxu1 %v117_v2 }
  0xf6   :  { %355 = vmatmul.mubr.bf16.vlgmr.msra.gmra.mrb[0].mxu1 %v116_v3 }
 0x1c9   :  { %v356_v11 = vpop.f32.mrb[0].mxu1 }
 0x1ca   :  { %v357_v12 = vadd.f32 %v356_v11, %v155_v9  ;;  %v358_v13 = vpop.f32.mrb[1].mxu1 }
 0x1cb   :  { %v359_v14 = vadd.f32 %v358_v13, %v159_v10  ;;  %v360_v15 = vpop.f32.mrb[2].mxu1 }
 0x1cc   :  { %v363_v16 = vmax.f32 %v357_v12, 0.0  ;;  %v361_v17 = vpop.f32.mrb[3].mxu1 }
 0x1cd   :  { %v364_v18 = vmax.f32 %v359_v14, 0.0 }
 0x1ce   :  { %v365_v20 = vpack.c.bf16 %v363_v16, %v363_v16 }
 0x1cf   :  { %v366_v19 = vpack.c.bf16 %v364_v18, %v364_v18 }
 0x1d1   :  { %534 = vmatprep.mubr.bf16.mxu0 %v366_v19 }
 0x1d2   :  { %535 = vmatmul.mubr.bf16.vlgmr.msra.gmra.mrb[4].mxu0 %v365_v20 }
 0x2a5   :  { %v629_v21 = vpop.f32.mrb[4].mxu0 }
 0x2a6   :  { %v630_v23 = vpop.f32.mrb[5].mxu0 }
 0x2a7   :  { %v631_v24 = vadd.f32 %v630_v23, %v629_v21  ;;  %v632_v25 = vpop.f32.mrb[6].mxu0 }
 0x2a8   :  { %v633_v26 = vpop.f32.mrb[7].mxu0 }
 0x2a9   :  { %v537_v27 = vadd.f32 %v631_v24, %v596_v22 }
 0x2ab   :  { %706 = vtanh.f32 %v537_v27 }
 0x2b5   :  { %v707_v28 = vpop.eup %706 }
 0x2b6   :  { %544 = vst.msk [vmem:[#allocation5] sm:$0x3] %vm543_vm2, %v707_v28 }
 0x2b7   :  { %741 = shalt.err (!%p738_p12)
}
 0x2b8   :  { %s742_s29 = scalar_lea.hbm %s895_s7, 32 }
 0x2b9   :  { %p743_p13 = scmp.ne.s32.totalorder %s895_s7, %s742_s29  ;;  %p746_p0 = scmp.lt.u32.totalorder %s742_s29, %s895_s7 }
 0x2bb   :  { %p748_p1 = pnand %p746_p0, %p743_p13 }
 0x2bd   :  { %751 = shalt.err (!%p748_p1)
}
 0x2be   :  { %554 = dma.vmem_to_hbm [thread:$0]  %s552_s26, 32, %s895_s7, [#allocation4]  }
 0x2bf   :  { %754 = dma.done.wait [#allocation4], 32  }
 0x2c0   :  { %755 = vsyncadd [#allocation4], 4294967264 }
 0x2c1   :  { %558 = vsyncpa [#allocation3], 1 }
 0x2c2   :  { %559 = vsyncpa [#allocation4], 1 }

</bundles_post_ra>
